<compile_context>
chip_gen: v6e
topology: v6e:2x2x1
jax: 0.10.0
libtpu: 0.0.40
codegen_flags: <defaults>
</compile_context>

<pallas_src>
import functools

import jax
import jax.numpy as jnp
from jax.experimental import pallas as pl
from jax.experimental.pallas import tpu as pltpu


def _round_up(x, m):
    return ((x + m - 1) // m) * m


def _apply_activation(y, activation):
    if activation == "relu":
        return jnp.maximum(y, 0.0)
    elif activation == "leaky_relu":
        return jnp.where(y > 0, y, 0.01 * y)  # PyTorch LeakyReLU default slope
    elif activation == "tanh":
        return jnp.tanh(y)
    elif activation == "sigmoid":
        return jax.nn.sigmoid(y)
    elif activation is None:
        return y
    else:
        raise ValueError(f"Unsupported activation function: {activation}")


def _fused_mlp_kernel(*refs, activations, compute_dtype):
    """Fused MLP: o = L_n(act(... act(L_0(x)) ...)).

    refs layout: (x_ref, w0_ref, b0_ref, w1_ref, b1_ref, ..., o_ref)
      x_ref: (TM, K0) activation tile (f32 or bf16)
      wi   : (Ki, Ni) compute_dtype, fully resident across grid steps
      bi   : (1,  Ni) f32
      o_ref: (TM, out_features) f32 output tile (true width, no lane padding)
    """
    x_ref = refs[0]
    o_ref = refs[-1]
    wb = refs[1:-1]
    n_layers = len(wb) // 2

    h = x_ref[...]
    for i in range(n_layers):
        w = wb[2 * i][...]
        b = wb[2 * i + 1][...]
        lhs = h if h.dtype == compute_dtype else h.astype(compute_dtype)
        # MXU matmul with f32 accumulation; bias + activation in f32.
        y = jnp.dot(lhs, w, preferred_element_type=jnp.float32)
        y = y + b
        if i < n_layers - 1:
            # Keep intermediates in the compute dtype between layers: halves the
            # live footprint; numerically identical since the next matmul would
            # cast to compute_dtype anyway.
            h = _apply_activation(y, activations[i]).astype(compute_dtype)
        else:
            h = _apply_activation(y, activations[i])  # last layer: no activation
    o_ref[...] = h.astype(o_ref.dtype)


def fused_mlp_pallas(x, params, activation="relu", *,
                     compute_dtype=jnp.bfloat16, max_tile_m=4096):
    """Single-pallas_call fused MLP forward.

    params: list of (w, b) with w shaped (in_features, out_features).
    """
    M, K = x.shape
    n_layers = len(params)
    out_features = params[-1][0].shape[1]

    # Build resident kernel operands (weights bf16/compute_dtype, biases f32).
    flat_inputs = []
    activations = []
    for idx, (w, b) in enumerate(params):
        activations.append(None if idx == n_layers - 1 else activation)
        flat_inputs.append(w.astype(compute_dtype))
        flat_inputs.append(b.astype(jnp.float32).reshape(1, -1))

    # Batch tiling: big tiles amortize the ~600-cycle per-grid-step overhead.
    # No padding of x: the Pallas pipeline clips the partial last block
    # (out-of-bounds tail rows are discarded on writeback; activations here are
    # bounded/clipped so garbage rows cannot poison anything).
    m_ceil = _round_up(M, 8)
    tm = min(max_tile_m, m_ceil)
    # Prefer >= 2 grid steps when the batch is big enough so the "parallel"
    # batch axis can be sharded across both TensorCores on v7x.
    if pl.cdiv(M, tm) < 2 and M >= 16:
        tm = _round_up(pl.cdiv(M, 2), 8)
    grid = (pl.cdiv(M, tm),)

    # Accept x in its native float dtype (bf16 passed through directly; no
    # wrapper cast pass). Cast to the MXU compute dtype happens in-kernel.
    if x.dtype not in (jnp.float32, jnp.bfloat16):
        x = x.astype(jnp.float32)

    in_specs = [pl.BlockSpec((tm, K), lambda i: (i, 0))]
    for t in flat_inputs:
        # Full array, constant block index -> stays resident across grid steps.
        in_specs.append(pl.BlockSpec(t.shape, lambda i: (0, 0)))
    # True-width output block: block last dim == full array last dim (legal).
    out_specs = pl.BlockSpec((tm, out_features), lambda i: (i, 0))

    # Explicit VMEM budget: double-buffered x/out blocks + resident params +
    # intermediates, with generous headroom but well under v7x's 64 MiB physical
    # and safe to request even against v5e's 16 MiB scoped default.
    max_width = max(w.shape[1] for w, _ in params)
    x_bytes = tm * K * x.dtype.itemsize
    out_bytes = tm * out_features * 4
    inter_bytes = tm * max_width * jnp.dtype(compute_dtype).itemsize
    param_bytes = sum(int(t.size) * t.dtype.itemsize for t in flat_inputs)
    vmem_need = 2 * (x_bytes + out_bytes) + param_bytes + 4 * inter_bytes
    vmem_limit = int(min(48 * 1024 * 1024, max(16 * 1024 * 1024, 2 * vmem_need)))

    # Advisory cost hint so XLA doesn't treat the custom call as free.
    flops = 2 * M * sum(w.shape[0] * w.shape[1] for w, _ in params)
    bytes_accessed = (int(x.size) * x.dtype.itemsize
                      + M * out_features * 4 + param_bytes)
    transcendentals = 0
    if activation in ("tanh", "sigmoid"):
        transcendentals = M * sum(w.shape[1] for w, _ in params[:-1])

    kernel = functools.partial(_fused_mlp_kernel,
                               activations=tuple(activations),
                               compute_dtype=compute_dtype)

    out = pl.pallas_call(
        kernel,
        out_shape=jax.ShapeDtypeStruct((M, out_features), jnp.float32),
        grid=grid,
        in_specs=in_specs,
        out_specs=out_specs,
        compiler_params=pltpu.CompilerParams(
            dimension_semantics=("parallel",),  # megacore-shardable on v7x
            vmem_limit_bytes=vmem_limit,
        ),
        cost_estimate=pl.CostEstimate(
            flops=flops,
            transcendentals=transcendentals,
            bytes_accessed=bytes_accessed,
        ),
    )(x, *flat_inputs)

    return out


def init_custom_nn_params(key, input_size, output_size, hidden_layers,
                          neurons_per_layer):
    """Deterministic init matching the PyTorch layer shapes.

    Mimics nn.Linear default init: U(-1/sqrt(fan_in), 1/sqrt(fan_in)).
    Weights stored transposed relative to PyTorch, i.e. (in, out).
    Requires len(neurons_per_layer) >= hidden_layers (same constraint the
    PyTorch module implicitly has for well-formed shapes).
    """
    assert len(neurons_per_layer) >= hidden_layers, (
        "neurons_per_layer must list at least `hidden_layers` widths")
    dims = [(input_size, neurons_per_layer[0])]
    for i in range(hidden_layers):
        in_f = neurons_per_layer[i]
        out_f = (neurons_per_layer[i + 1]
                 if i < len(neurons_per_layer) - 1 else neurons_per_layer[i])
        dims.append((in_f, out_f))
    dims.append((neurons_per_layer[-1], output_size))

    params = []
    for (fan_in, fan_out) in dims:
        key, kw, kb = jax.random.split(key, 3)
        bound = 1.0 / jnp.sqrt(jnp.float32(fan_in))
        w = jax.random.uniform(kw, (fan_in, fan_out), jnp.float32, -bound, bound)
        b = jax.random.uniform(kb, (fan_out,), jnp.float32, -bound, bound)
        params.append((w, b))
    return params


def custom_nn_forward(x, params, activation="relu",
                      compute_dtype=jnp.bfloat16):
    """Forward pass equivalent to CustomNN.forward (act on all but last layer)."""
    # TODO(synk): dropout_prob>0 / use_batch_norm=True paths not exercised
    # (defaults are 0.0 / False); BatchNorm1d(track_running_stats=False) and
    # Dropout would need batch-statistics / pltpu PRNG variants of the kernel.
    return fused_mlp_pallas(x, params, activation=activation,
                            compute_dtype=compute_dtype)


def custom_nn_reference(x, params, activation="relu",
                        compute_dtype=jnp.bfloat16):
    """Pure-JAX reference with the same precision policy as the kernel."""
    n = len(params)
    h = x.astype(jnp.float32)
    for idx, (w, b) in enumerate(params):
        y = jnp.dot(h.astype(compute_dtype), w.astype(compute_dtype),
                    preferred_element_type=jnp.float32)
        y = y + b.astype(jnp.float32)
        if idx < n - 1:
            h = _apply_activation(y, activation).astype(compute_dtype)
        else:
            h = y
    return h.astype(jnp.float32)


if __name__ == "__main__":
    # Small, deterministic config.
    input_size = 32
    output_size = 8
    hidden_layers = 2
    neurons_per_layer = [64, 64, 64]
    batch = 8

    key = jax.random.PRNGKey(0)
    key, kx = jax.random.split(key)
    x = jax.random.normal(kx, (batch, input_size), jnp.float32)

    params = init_custom_nn_params(key, input_size, output_size,
                                   hidden_layers, neurons_per_layer)

    out = custom_nn_forward(x, params, activation="relu")
    out = jax.block_until_ready(out)

    ref = custom_nn_reference(x, params, activation="relu")
    assert out.shape == (batch, output_size), out.shape
    assert jnp.allclose(out, ref, atol=2e-2, rtol=2e-2), "mismatch vs reference"

    # Also exercise a ragged, multi-tile batch path (partial-block clipping +
    # >=2 grid steps) to make sure the no-padding pipeline is correct.
    key, kx2 = jax.random.split(key)
    x2 = jax.random.normal(kx2, (37, input_size), jnp.float32)
    out2 = jax.block_until_ready(
        fused_mlp_pallas(x2, params, activation="relu", max_tile_m=16))
    ref2 = custom_nn_reference(x2, params, activation="relu")
    assert out2.shape == (37, output_size), out2.shape
    assert jnp.allclose(out2, ref2, atol=2e-2, rtol=2e-2), "ragged mismatch"

    print("KERNEL_OK")
</pallas_src>

<mosaic_0001>
module attributes {stable_mosaic.version = 11 : i64} {
  func.func @_fused_mlp_kernel(%arg0: i32, %arg1: memref<8x32xf32, #tpu.memory_space<vmem>>, %arg2: memref<32x64xbf16, #tpu.memory_space<vmem>>, %arg3: memref<1x64xf32, #tpu.memory_space<vmem>>, %arg4: memref<64x64xbf16, #tpu.memory_space<vmem>>, %arg5: memref<1x64xf32, #tpu.memory_space<vmem>>, %arg6: memref<64x64xbf16, #tpu.memory_space<vmem>>, %arg7: memref<1x64xf32, #tpu.memory_space<vmem>>, %arg8: memref<64x8xbf16, #tpu.memory_space<vmem>>, %arg9: memref<1x8xf32, #tpu.memory_space<vmem>>, %arg10: memref<8x8xf32, #tpu.memory_space<vmem>>) attributes {dimension_semantics = [#tpu.dimension_semantics<parallel>], iteration_bounds = array<i64: 1>, scalar_prefetch = 0 : i64, scratch_operands = 0 : i64, tpu.core_type = #tpu.core_type<tc>, window_params = [{transform_indices = @transform_0, window_bounds = array<i64: 8, 32>}, {pipeline_mode = #tpu.pipeline_mode<synchronous>, transform_indices = @transform_1, window_bounds = array<i64: 32, 64>}, {pipeline_mode = #tpu.pipeline_mode<synchronous>, transform_indices = @transform_2, window_bounds = array<i64: 1, 64>}, {pipeline_mode = #tpu.pipeline_mode<synchronous>, transform_indices = @transform_3, window_bounds = array<i64: 64, 64>}, {pipeline_mode = #tpu.pipeline_mode<synchronous>, transform_indices = @transform_4, window_bounds = array<i64: 1, 64>}, {pipeline_mode = #tpu.pipeline_mode<synchronous>, transform_indices = @transform_5, window_bounds = array<i64: 64, 64>}, {pipeline_mode = #tpu.pipeline_mode<synchronous>, transform_indices = @transform_6, window_bounds = array<i64: 1, 64>}, {pipeline_mode = #tpu.pipeline_mode<synchronous>, transform_indices = @transform_7, window_bounds = array<i64: 64, 8>}, {pipeline_mode = #tpu.pipeline_mode<synchronous>, transform_indices = @transform_8, window_bounds = array<i64: 1, 8>}, {transform_indices = @transform_9, window_bounds = array<i64: 8, 8>}]} {
    %c0 = arith.constant 0 : index
    %c0_0 = arith.constant 0 : index
    %0 = vector.load %arg1[%c0, %c0_0] : memref<8x32xf32, #tpu.memory_space<vmem>>, vector<8x32xf32>
    %c0_1 = arith.constant 0 : index
    %c0_2 = arith.constant 0 : index
    %1 = vector.load %arg2[%c0_1, %c0_2] : memref<32x64xbf16, #tpu.memory_space<vmem>>, vector<32x64xbf16>
    %c0_3 = arith.constant 0 : index
    %c0_4 = arith.constant 0 : index
    %2 = vector.load %arg3[%c0_3, %c0_4] : memref<1x64xf32, #tpu.memory_space<vmem>>, vector<1x64xf32>
    %3 = arith.truncf %0 : vector<8x32xf32> to vector<8x32xbf16>
    %cst = arith.constant dense<0.000000e+00> : vector<8x64xf32>
    %4 = tpu.matmul %3, %1, %cst {dimension_numbers = #tpu.dot_dimension_numbers<[1], [0], [0], [1], [0, 0, 1, 1], [], []>} : vector<8x32xbf16>, vector<32x64xbf16>, vector<8x64xf32> -> vector<8x64xf32>
    %5 = vector.broadcast %2 : vector<1x64xf32> to vector<8x64xf32>
    %6 = arith.addf %4, %5 : vector<8x64xf32>
    %cst_5 = arith.constant 0.000000e+00 : f32
    %7 = vector.broadcast %cst_5 : f32 to vector<8x64xf32>
    %8 = arith.maximumf %6, %7 : vector<8x64xf32>
    %9 = arith.truncf %8 : vector<8x64xf32> to vector<8x64xbf16>
    %c0_6 = arith.constant 0 : index
    %c0_7 = arith.constant 0 : index
    %10 = vector.load %arg4[%c0_6, %c0_7] : memref<64x64xbf16, #tpu.memory_space<vmem>>, vector<64x64xbf16>
    %c0_8 = arith.constant 0 : index
    %c0_9 = arith.constant 0 : index
    %11 = vector.load %arg5[%c0_8, %c0_9] : memref<1x64xf32, #tpu.memory_space<vmem>>, vector<1x64xf32>
    %cst_10 = arith.constant dense<0.000000e+00> : vector<8x64xf32>
    %12 = tpu.matmul %9, %10, %cst_10 {dimension_numbers = #tpu.dot_dimension_numbers<[1], [0], [0], [1], [0, 0, 1, 1], [], []>} : vector<8x64xbf16>, vector<64x64xbf16>, vector<8x64xf32> -> vector<8x64xf32>
    %13 = vector.broadcast %11 : vector<1x64xf32> to vector<8x64xf32>
    %14 = arith.addf %12, %13 : vector<8x64xf32>
    %cst_11 = arith.constant 0.000000e+00 : f32
    %15 = vector.broadcast %cst_11 : f32 to vector<8x64xf32>
    %16 = arith.maximumf %14, %15 : vector<8x64xf32>
    %17 = arith.truncf %16 : vector<8x64xf32> to vector<8x64xbf16>
    %c0_12 = arith.constant 0 : index
    %c0_13 = arith.constant 0 : index
    %18 = vector.load %arg6[%c0_12, %c0_13] : memref<64x64xbf16, #tpu.memory_space<vmem>>, vector<64x64xbf16>
    %c0_14 = arith.constant 0 : index
    %c0_15 = arith.constant 0 : index
    %19 = vector.load %arg7[%c0_14, %c0_15] : memref<1x64xf32, #tpu.memory_space<vmem>>, vector<1x64xf32>
    %cst_16 = arith.constant dense<0.000000e+00> : vector<8x64xf32>
    %20 = tpu.matmul %17, %18, %cst_16 {dimension_numbers = #tpu.dot_dimension_numbers<[1], [0], [0], [1], [0, 0, 1, 1], [], []>} : vector<8x64xbf16>, vector<64x64xbf16>, vector<8x64xf32> -> vector<8x64xf32>
    %21 = vector.broadcast %19 : vector<1x64xf32> to vector<8x64xf32>
    %22 = arith.addf %20, %21 : vector<8x64xf32>
    %cst_17 = arith.constant 0.000000e+00 : f32
    %23 = vector.broadcast %cst_17 : f32 to vector<8x64xf32>
    %24 = arith.maximumf %22, %23 : vector<8x64xf32>
    %25 = arith.truncf %24 : vector<8x64xf32> to vector<8x64xbf16>
    %c0_18 = arith.constant 0 : index
    %c0_19 = arith.constant 0 : index
    %26 = vector.load %arg8[%c0_18, %c0_19] : memref<64x8xbf16, #tpu.memory_space<vmem>>, vector<64x8xbf16>
    %c0_20 = arith.constant 0 : index
    %c0_21 = arith.constant 0 : index
    %27 = vector.load %arg9[%c0_20, %c0_21] : memref<1x8xf32, #tpu.memory_space<vmem>>, vector<1x8xf32>
    %cst_22 = arith.constant dense<0.000000e+00> : vector<8x8xf32>
    %28 = tpu.matmul %25, %26, %cst_22 {dimension_numbers = #tpu.dot_dimension_numbers<[1], [0], [0], [1], [0, 0, 1, 1], [], []>} : vector<8x64xbf16>, vector<64x8xbf16>, vector<8x8xf32> -> vector<8x8xf32>
    %29 = vector.broadcast %27 : vector<1x8xf32> to vector<8x8xf32>
    %30 = arith.addf %28, %29 : vector<8x8xf32>
    %c0_23 = arith.constant 0 : index
    %c0_24 = arith.constant 0 : index
    %31 = vector.load %arg10[%c0_23, %c0_24] : memref<8x8xf32, #tpu.memory_space<vmem>>, vector<8x8xf32>
    tpu.vector_store %arg10[%c0_23, %c0_24], %30 {strides = array<i32>} : memref<8x8xf32, #tpu.memory_space<vmem>>, vector<8x8xf32>,
    return
  }
  func.func @transform_0(%arg0: i32) -> (i32, i32) {
    %c0_i32 = arith.constant 0 : i32
    %c0_i32_0 = arith.constant 0 : i32
    return %arg0, %c0_i32 : i32, i32
  }
  func.func @transform_1(%arg0: i32) -> (i32, i32) {
    %c0_i32 = arith.constant 0 : i32
    %c0_i32_0 = arith.constant 0 : i32
    %c0_i32_1 = arith.constant 0 : i32
    return %c0_i32, %c0_i32_0 : i32, i32
  }
  func.func @transform_2(%arg0: i32) -> (i32, i32) {
    %c0_i32 = arith.constant 0 : i32
    %c0_i32_0 = arith.constant 0 : i32
    %c0_i32_1 = arith.constant 0 : i32
    return %c0_i32, %c0_i32_0 : i32, i32
  }
  func.func @transform_3(%arg0: i32) -> (i32, i32) {
    %c0_i32 = arith.constant 0 : i32
    %c0_i32_0 = arith.constant 0 : i32
    %c0_i32_1 = arith.constant 0 : i32
    return %c0_i32, %c0_i32_0 : i32, i32
  }
  func.func @transform_4(%arg0: i32) -> (i32, i32) {
    %c0_i32 = arith.constant 0 : i32
    %c0_i32_0 = arith.constant 0 : i32
    %c0_i32_1 = arith.constant 0 : i32
    return %c0_i32, %c0_i32_0 : i32, i32
  }
  func.func @transform_5(%arg0: i32) -> (i32, i32) {
    %c0_i32 = arith.constant 0 : i32
    %c0_i32_0 = arith.constant 0 : i32
    %c0_i32_1 = arith.constant 0 : i32
    return %c0_i32, %c0_i32_0 : i32, i32
  }
  func.func @transform_6(%arg0: i32) -> (i32, i32) {
    %c0_i32 = arith.constant 0 : i32
    %c0_i32_0 = arith.constant 0 : i32
    %c0_i32_1 = arith.constant 0 : i32
    return %c0_i32, %c0_i32_0 : i32, i32
  }
  func.func @transform_7(%arg0: i32) -> (i32, i32) {
    %c0_i32 = arith.constant 0 : i32
    %c0_i32_0 = arith.constant 0 : i32
    %c0_i32_1 = arith.constant 0 : i32
    return %c0_i32, %c0_i32_0 : i32, i32
  }
  func.func @transform_8(%arg0: i32) -> (i32, i32) {
    %c0_i32 = arith.constant 0 : i32
    %c0_i32_0 = arith.constant 0 : i32
    %c0_i32_1 = arith.constant 0 : i32
    return %c0_i32, %c0_i32_0 : i32, i32
  }
  func.func @transform_9(%arg0: i32) -> (i32, i32) {
    %c0_i32 = arith.constant 0 : i32
    %c0_i32_0 = arith.constant 0 : i32
    return %arg0, %c0_i32 : i32, i32
  }
}

</mosaic_0001>

<bundles_post_ra>
// kernel: tpu_custom_call.1
= control target key start
LH: loop header
LB: loop body
LE: loop exit
PB: predicated region body
PF: predicated region fallthrough
CT: control target
= control target key end

     0   :  { %14 = vsyncpa [#allocation3], 0  ;;  %s736_s0 = inlined_call_operand.vmem [shape: f32[8,32], index: 0, kind: input, shape index: {}]   ;;  %s737_s1 = inlined_call_operand.hbm [shape: bf16[32,64], index: 1, kind: input, shape index: {}]   ;;  %s738_s2 = inlined_call_operand.vmem [shape: f32[1,64], index: 2, kind: input, shape index: {}]   ;;  %s739_s3 = inlined_call_operand.vmem [shape: bf16[64,64], index: 3, kind: input, shape index: {}]   ;;  %s740_s4 = inlined_call_operand.hbm [shape: f32[1,64], index: 4, kind: input, shape index: {}]   ;;  %s741_s5 = inlined_call_operand.hbm [shape: bf16[64,64], index: 5, kind: input, shape index: {}]   ;;  %s742_s6 = inlined_call_operand.vmem [shape: f32[1,64], index: 6, kind: input, shape index: {}]   ;;  %s743_s7 = inlined_call_operand.vmem [shape: bf16[64,8], index: 7, kind: input, shape index: {}]   ;;  %s744_s8 = inlined_call_operand.vmem [shape: f32[1,8], index: 8, kind: input, shape index: {}]   ;;  %s745_s9 = inlined_call_operand.hbm [shape: f32[8,8], index: 9, kind: output, shape index: {}]  }
   0x1   :  { %15 = vsyncpa [#allocation6], 0 }
   0x2   :  { %16 = vsyncpa [#allocation4], 0  ;;  %s605_s30 = smov [#allocation5]   ;;  %s606_s11 = smov [#allocation2]  }
   0x3   :  { %s41_s10 = sshll.u32 %s605_s30, 4  ;;  %s24_s12 = sshll.u32 %s606_s11, 4  ;;  %s42_s10 = int_to_ptr.vmem [resolvable:$true] %s41_s10  ;;  %s25_s12 = int_to_ptr.vmem [resolvable:$true] %s24_s12 }
   0x4   :  { %s527_s13 = scalar_lea.vmem %s42_s10, 16  ;;  %s531_s14 = scalar_lea.vmem %s42_s10, 32 }
   0x5   :  { %p528_p0 = scmp.ne.s32.totalorder %s42_s10, %s527_s13  ;;  %p532_p1 = scmp.lt.s32.totalorder %s42_s10, %s42_s10 }
   0x6   :  { %p533_p2 = scmp.lt.s32.totalorder %s531_s14, %s527_s13 }
   0x8   :  { %p534_p3 = por %p533_p2, %p532_p1 }
   0xa   :  { %p535_p4 = pnand %p534_p3, %p528_p0 }
   0xc   :  { %538 = shalt.err (!%p535_p4)
}
   0xd   :  { %44 = dma.hbm_to_vmem [thread:$0]  %s740_s4, 16, %s42_s10, [#allocation6]  }
   0xe   :  { %s547_s17 = scalar_lea.vmem %s25_s12, 256  ;;  %p552_p6 = scmp.lt.s32.totalorder %s25_s12, %s25_s12 }
   0xf   :  { %p548_p5 = scmp.ne.s32.totalorder %s25_s12, %s547_s17  ;;  %p553_p7 = scmp.lt.s32.totalorder %s547_s17, %s547_s17 }
  0x11   :  { %p554_p8 = por %p553_p7, %p552_p6 }
  0x13   :  { %p555_p9 = pnand %p554_p8, %p548_p5 }
  0x15   :  { %558 = shalt.err (!%p555_p9)
}
  0x16   :  { %s607_s18 = smov 64   ;;  %s608_s19 = smov 4  }
  0x17   :  { %30 = dma.hbm_to_vmem [thread:$0]  %s737_s1, 256, %s25_s12, [#allocation3], %s607_s18, %s607_s18, %s608_s19  }
  0x18   :  { %s609_s22 = smov [#allocation7]  }
  0x19   :  { %s50_s23 = sshll.u32 %s609_s22, 4  ;;  %s51_s23 = int_to_ptr.vmem [resolvable:$true] %s50_s23 }
  0x1a   :  { %s567_s24 = scalar_lea.vmem %s51_s23, 512  ;;  %p572_p11 = scmp.lt.s32.totalorder %s51_s23, %s51_s23 }
  0x1b   :  { %p568_p10 = scmp.ne.s32.totalorder %s51_s23, %s567_s24  ;;  %p573_p12 = scmp.lt.s32.totalorder %s567_s24, %s567_s24 }
  0x1d   :  { %p574_p13 = por %p573_p12, %p572_p11 }
  0x1f   :  { %p575_p0 = pnand %p574_p13, %p568_p10 }
  0x21   :  { %578 = shalt.err (!%p575_p0)
}
  0x22   :  { %56 = dma.hbm_to_vmem [thread:$0]  %s741_s5, 512, %s51_s23, [#allocation6], %s607_s18, %s607_s18, %s608_s19  }
  0x23   :  { %599 = dma.done.wait [#allocation3], 256  }
  0x24   :  { %600 = vsyncadd [#allocation3], 4294967040 }
  0x25   :  { %601 = dma.done.wait [#allocation6], 528  }
  0x26   :  { %602 = vsyncadd [#allocation6], 4294966768  ;;  %v610_v0 = vmov 0.0   ;;  %vm611_vm0 = vmmov 0   ;;  %v505_v1 = vld [vmem:[#allocation2 + $0x8] sm:$0xff]   ;;  %v506_v2 = vld [vmem:[#allocation2] sm:$0xff]  }
  0x27   :  { %453 = vmatprep.subr.bf16.mxu0 %v610_v0  ;;  %457 = vmatprep.mubr.msk.bf16.mxu0 %vm611_vm0, %v610_v0  ;;  %v73_v3 = vld [vmem:[%s736_s0] sm:$0xff]  ;;  %v507_v4 = vld [vmem:[%s739_s3 + $0x18] sm:$0xff]   ;;  %vm98_vm1 = vcmask 261120   ;;  %v508_v5 = vld [vmem:[%s739_s3 + $0x10] sm:$0xff]   ;;  %vm183_vm2 = vcmask 523264   ;;  %s612_s24 = smov [#allocation8]  }
  0x28   :  { %461 = vmatprep.subr.bf16.mxu1 %v610_v0  ;;  %469 = vmatprep.mubr.msk.bf16.mxu1 %vm611_vm0, %v610_v0  ;;  %v79_v6 = vpack.c.bf16 %v73_v3, %v73_v3  ;;  %v509_v7 = vld [vmem:[%s739_s3 + $0x8] sm:$0xff]   ;;  %v510_v8 = vld [vmem:[%s739_s3] sm:$0xff]   ;;  %v514_v20 = vld [vmem:[#allocation7] sm:$0xff]   ;;  %vm395_vm3 = vcmask 64512  }
  0x29   :  { %454 = vmatpush3.bf16.msra.mxu0 %v505_v1  ;;  %462 = vmatpush3.bf16.msra.mxu1 %v507_v4  ;;  %v511_v9 = vld [vmem:[#allocation7 + $0x18] sm:$0xff]   ;;  %v512_v10 = vld [vmem:[#allocation7 + $0x10] sm:$0xff]   ;;  %v413_v11 = vld [vmem:[%s738_s2] ss:$0 sm:$0xff] }
  0x2a   :  { %455 = vmatprep.subr.bf16.mxu0 %v610_v0  ;;  %463 = vmatprep.subr.bf16.mxu1 %v610_v0  ;;  %v513_v19 = vld [vmem:[#allocation7 + $0x8] sm:$0xff]   ;;  %v516_v22 = vld [vmem:[%s743_s7 + $0x10] sm:$0xff]   ;;  %v517_v31 = vld [vmem:[%s743_s7 + $0x8] sm:$0xff]  }
  0x2b   :  { %v515_v21 = vld [vmem:[%s743_s7 + $0x18] sm:$0xff]   ;;  %v417_v23 = vld [vmem:[#allocation5] ss:$0 sm:$0xff]  ;;  %v518_v32 = vld [vmem:[%s743_s7] sm:$0xff]   ;;  %s403_s7 = sshll.u32 %s612_s24, 4  ;;  %s404_s7 = int_to_ptr.vmem [resolvable:$true] %s403_s7 }
  0x2c   :  { %v423_v33 = vld [vmem:[%s742_s6] ss:$0 sm:$0xff]  ;;  %s579_s6 = scalar_lea.vmem %s404_s7, 128  ;;  %p584_p2 = scmp.lt.s32.totalorder %s404_s7, %s404_s7 }
  0x2d   :  { %456 = vmatpush3.bf16.msra.mxu0 %v506_v2  ;;  %464 = vmatpush3.bf16.msra.mxu1 %v508_v5  ;;  %v429_v41 = vld [vmem:[%s744_s8] ss:$0 sm:$0xff]  ;;  %p580_p1 = scmp.ne.s32.totalorder %s404_s7, %s579_s6  ;;  %p585_p3 = scmp.lt.s32.totalorder %s579_s6, %s579_s6 }
  0x2e   :  { %473 = vmatprep.subr.bf16.mxu0 %v610_v0  ;;  %465 = vmatprep.subr.bf16.mxu1 %v610_v0 }
  0x2f   :  { %p586_p4 = por %p585_p3, %p584_p2 }
  0x30   :  { %458 = vmatmul.mubr.msk.bf16.vlgmr.msra.gmra.mxu0 %vm98_vm1, %v79_v6 }
  0x31   :  { %481 = vmatprep.mubr.msk.bf16.mxu0 %vm611_vm0, %v610_v0  ;;  %466 = vmatpush3.bf16.msra.mxu1 %v509_v7  ;;  %p587_p5 = pnand %p586_p4, %p580_p1 }
  0x32   :  { %467 = vmatprep.subr.bf16.mxu1 %v610_v0  ;;  %474 = vmatpush3.bf16.msra.mxu0 %v511_v9 }
  0x33   :  { %475 = vmatprep.subr.bf16.mxu0 %v610_v0 }
  0x35   :  { %468 = vmatpush3.bf16.msra.mxu1 %v510_v8 }
  0x36   :  { %485 = vmatprep.subr.bf16.mxu1 %v610_v0  ;;  %476 = vmatpush3.bf16.msra.mxu0 %v512_v10 }
  0x37   :  { %477 = vmatprep.subr.bf16.mxu0 %v610_v0 }
  0x3a   :  { %478 = vmatpush3.bf16.msra.mxu0 %v513_v19 }
  0x3b   :  { %479 = vmatprep.subr.bf16.mxu0 %v610_v0 }
  0x3e   :  { %480 = vmatpush3.bf16.msra.mxu0 %v514_v20 }
  0xf0   :  { %v136_v12 = vpop.f32.mrf.mxu0 }
  0xf1   :  { %v137_v13 = vadd.f32 %v413_v11, %v136_v12 }
  0xf2   :  { %v459_v14 = vpop.f32.mrf.mxu0 }
  0xf3   :  { %v142_v15 = vmax.f32 %v137_v13, 0.0 }
  0xf4   :  { %v139_v16 = vpop.f32.mrf.mxu0 }
  0xf5   :  { %v143_v17 = vpack.c.bf16 %v142_v15, %v142_v15 }
  0xf6   :  { %v460_v18 = vpop.f32.mrf.mxu0 }
  0xf7   :  { %470 = vmatmul.mubr.msk.bf16.vlgmr.msra.gmra.mxu1 %vm183_vm2, %v143_v17 }
  0xf8   :  { %493 = vmatprep.mubr.msk.bf16.mxu1 %vm611_vm0, %v610_v0  ;;  %486 = vmatpush3.bf16.msra.mxu1 %v515_v21 }
  0xf9   :  { %487 = vmatprep.subr.bf16.mxu1 %v610_v0 }
  0xfc   :  { %488 = vmatpush3.bf16.msra.mxu1 %v516_v22 }
  0xfd   :  { %489 = vmatprep.subr.bf16.mxu1 %v610_v0 }
 0x100   :  { %490 = vmatpush3.bf16.msra.mxu1 %v517_v31 }
 0x101   :  { %491 = vmatprep.subr.bf16.mxu1 %v610_v0 }
 0x104   :  { %492 = vmatpush3.bf16.msra.mxu1 %v518_v32 }
 0x1b7   :  { %v221_v24 = vpop.f32.mrf.mxu1 }
 0x1b8   :  { %v222_v25 = vadd.f32 %v417_v23, %v221_v24 }
 0x1b9   :  { %v471_v26 = vpop.f32.mrf.mxu1 }
 0x1ba   :  { %v227_v27 = vmax.f32 %v222_v25, 0.0 }
 0x1bb   :  { %v224_v28 = vpop.f32.mrf.mxu1 }
 0x1bc   :  { %v228_v29 = vpack.c.bf16 %v227_v27, %v227_v27 }
 0x1bd   :  { %v472_v30 = vpop.f32.mrf.mxu1 }
 0x1be   :  { %482 = vmatmul.mubr.msk.bf16.vlgmr.msra.gmra.mxu0 %vm183_vm2, %v228_v29 }
 0x27e   :  { %v305_v34 = vpop.f32.mrf.mxu0 }
 0x27f   :  { %v306_v35 = vadd.f32 %v423_v33, %v305_v34 }
 0x280   :  { %v483_v36 = vpop.f32.mrf.mxu0 }
 0x281   :  { %v311_v37 = vmax.f32 %v306_v35, 0.0 }
 0x282   :  { %v308_v38 = vpop.f32.mrf.mxu0 }
 0x283   :  { %v312_v39 = vpack.c.bf16 %v311_v37, %v311_v37 }
 0x284   :  { %v484_v40 = vpop.f32.mrf.mxu0 }
 0x285   :  { %494 = vmatmul.mubr.msk.bf16.vlgmr.msra.gmra.mxu1 %vm183_vm2, %v312_v39 }
 0x345   :  { %v389_v42 = vpop.f32.mrf.mxu1 }
 0x346   :  { %v390_v43 = vadd.f32 %v429_v41, %v389_v42 }
 0x347   :  { %v495_v44 = vpop.f32.mrf.mxu1 }
 0x348   :  { %396 = vst.msk [vmem:[#allocation8] sm:$0xff] %vm395_vm3, %v390_v43 }
 0x349   :  { %v392_v45 = vpop.f32.mrf.mxu1 }
 0x34a   :  { %590 = shalt.err (!%p587_p5)
}
 0x34b   :  { %406 = dma.vmem_to_hbm [thread:$0]  %s404_s7, 128, %s745_s9, [#allocation4]   ;;  %v496_v46 = vpop.f32.mrf.mxu1 }
 0x34c   :  { %603 = dma.done.wait [#allocation4], 128  }
 0x34d   :  { %604 = vsyncadd [#allocation4], 4294967168 }
 0x34e   :  { %410 = vsyncpa [#allocation3], 1 }
 0x34f   :  { %411 = vsyncpa [#allocation6], 1 }
 0x350   :  { %412 = vsyncpa [#allocation4], 1 }

</bundles_post_ra>
